<compile_context>
chip_gen: v5e
topology: v5e:2x2
jax: 0.10.0
libtpu: 0.0.40
codegen_flags: <defaults>
</compile_context>

<pallas_src>
import jax
import jax.numpy as jnp
from jax.experimental import pallas as pl
from jax.experimental.pallas import tpu as pltpu

BN_EPS = 1e-5
KSIZE = 3
IN_FEATS = 10          # fc input features (from .view(-1, 10))
OUT_FEATS = 20         # fc output features
LANE = 128             # lane-dense output / param-slab width

# Layout of the single (PARAM_ROWS, LANE) parameter slab.
PARAM_ROWS = 32
FC_ROW0 = 0            # rows 0..9   : fc weight W^T, zero-padded to 128 lanes
COLSUM_ROW = 10        # row 10      : column sums of the padded W^T
CW_ROW0 = 16           # rows 16..30 : conv weight (C=15 rows, K=3 lanes)


def fused_kernel(x_ref, bn_ref, p_ref, out_ref, t_ref, f_ref):
    # x_ref  : (C+2, NL) VMEM  rows 0..C-1 = activation (channels on sublanes, N*L on
    #                          lanes); row C = mask_a, row C+1 = mask_b (boundary masks)
    # bn_ref : (2,)      SMEM  [gamma, beta]
    # p_ref  : (32, 128) VMEM  param slab (fc weight / colsum / conv weight)
    # out_ref: (M, 128)  VMEM  lane-dense output slab; real data in [:, :OUT_FEATS]
    # t_ref  : (3, NL+2) VMEM  tap scatter buffer
    # f_ref  : (M, 10)   VMEM  feats bounce buffer (lane->sublane reshape through memory)
    cp2, nl = x_ref.shape
    c = cp2 - 2
    m_rows = f_ref.shape[0]

    x = x_ref[pl.ds(0, c), :]                     # (C, NL) — single activation read
    mask_a = x_ref[pl.ds(c, 1), :]                # (1, NL): 0 where l == L-1 (tap k=0)
    mask_b = x_ref[pl.ds(c + 1, 1), :]            # (1, NL): 0 where l == 0   (tap k=2)

    w0 = p_ref[pl.ds(CW_ROW0, c), pl.ds(0, 1)]    # (C, 1) conv taps
    w1 = p_ref[pl.ds(CW_ROW0, c), pl.ds(1, 1)]
    w2 = p_ref[pl.ds(CW_ROW0, c), pl.ds(2, 1)]

    # Per-tap weighted channel reduction: VPU multiply + one sublane reduce each.
    r0 = jnp.sum(x * w0, axis=0, keepdims=True) * mask_a     # (1, NL)
    r1 = jnp.sum(x * w1, axis=0, keepdims=True)               # (1, NL)
    r2 = jnp.sum(x * w2, axis=0, keepdims=True) * mask_b      # (1, NL)

    # Scatter the tap rows at lane offsets 0/1/2; the center window [:, 1:NL+1] of the
    # scratch then holds the three addends of conv_out[j] = r0[j-1] + r1[j] + r2[j+1].
    t_ref[...] = jnp.zeros(t_ref.shape, jnp.float32)
    t_ref[pl.ds(0, 1), pl.ds(0, nl)] = r2
    t_ref[pl.ds(1, 1), pl.ds(1, nl)] = r1
    t_ref[pl.ds(2, 1), pl.ds(2, nl)] = r0

    # Gather conv output per FC row; this also performs the (1, NL) -> (M, 10) reshape
    # through VMEM (no in-register lane->sublane relayout needed).
    for m in range(m_rows):
        chunk = t_ref[:, pl.ds(1 + m * IN_FEATS, IN_FEATS)]   # (3, 10)
        f_ref[pl.ds(m, 1), :] = jnp.sum(chunk, axis=0, keepdims=True)

    feats = f_ref[...]                                         # (M, 10) raw conv output

    # BatchNorm1d(1, track_running_stats=False): centered two-pass batch statistics.
    n_elems = jnp.float32(m_rows * IN_FEATS)
    mean = jnp.sum(feats, keepdims=True) / n_elems             # (1, 1)
    diff = feats - mean
    var = jnp.sum(diff * diff, keepdims=True) / n_elems        # biased variance
    gamma = bn_ref[0]
    beta = bn_ref[1]
    a = gamma * jax.lax.rsqrt(var + BN_EPS)                    # BN scale
    b = beta - mean * a                                        # BN shift

    # Linear(10, 20, bias=False) with the BN affine folded into the epilogue:
    #   sigmoid((a*feats + b) @ W) = sigmoid(a*(feats @ W) + b * colsum(W))
    fcw = p_ref[pl.ds(FC_ROW0, IN_FEATS), :]                   # (10, 128)
    colsum = p_ref[pl.ds(COLSUM_ROW, 1), :]                    # (1, 128)
    logits = a * jnp.dot(feats, fcw, preferred_element_type=jnp.float32)
    logits = logits + b * colsum
    out_ref[...] = jax.nn.sigmoid(logits)                      # (M, 128) lane-dense store


def prepare_params(conv_w, bn_gamma, bn_beta, fc_w):
    """One-time parameter prep (call at parameter-load time, NOT per forward)."""
    c = conv_w.shape[1]
    fcw_pad = jnp.zeros((IN_FEATS, LANE), jnp.float32).at[:, :OUT_FEATS].set(
        fc_w.T.astype(jnp.float32))
    slab = jnp.zeros((PARAM_ROWS, LANE), jnp.float32)
    slab = slab.at[FC_ROW0:FC_ROW0 + IN_FEATS, :].set(fcw_pad)
    slab = slab.at[COLSUM_ROW, :].set(jnp.sum(fcw_pad, axis=0))
    slab = slab.at[CW_ROW0:CW_ROW0 + c, :KSIZE].set(conv_w[0].astype(jnp.float32))
    bn = jnp.stack([bn_gamma[0], bn_beta[0]]).astype(jnp.float32)   # (2,)
    return slab, bn


@jax.jit
def model_forward(x, slab, bn):
    """x: (N, 15, L) f32; slab/bn from prepare_params. Returns (N*L//10, 20)."""
    n, c, l = x.shape
    nl = n * l
    assert nl % IN_FEATS == 0, "view(-1, 10) requires N*L divisible by 10"
    m_rows = nl // IN_FEATS

    # Activation re-layout: channels on sublanes, N*L on lanes; append the two
    # per-sample boundary-mask rows (constant-folded by XLA, fused with the transpose).
    x_cl = jnp.transpose(x, (1, 0, 2)).reshape(c, nl)
    pos = jnp.arange(nl, dtype=jnp.int32) % l
    mask_a = (pos != l - 1).astype(jnp.float32)[None, :]
    mask_b = (pos != 0).astype(jnp.float32)[None, :]
    x_aug = jnp.concatenate([x_cl, mask_a, mask_b], axis=0)         # (C+2, NL)

    out_pad = pl.pallas_call(
        fused_kernel,
        out_shape=jax.ShapeDtypeStruct((m_rows, LANE), jnp.float32),
        in_specs=[
            pl.BlockSpec(memory_space=pltpu.MemorySpace.VMEM),   # x_aug (C+2, NL)
            pl.BlockSpec(memory_space=pltpu.MemorySpace.SMEM),   # bn [gamma, beta]
            pl.BlockSpec(memory_space=pltpu.MemorySpace.VMEM),   # param slab (32, 128)
        ],
        out_specs=pl.BlockSpec(memory_space=pltpu.MemorySpace.VMEM),
        scratch_shapes=[
            pltpu.VMEM((KSIZE, nl + 2), jnp.float32),            # tap scatter buffer
            pltpu.VMEM((m_rows, IN_FEATS), jnp.float32),         # feats bounce buffer
        ],
    )(x_aug, bn, slab)

    # Trailing slice fuses into this jit; consumers that can take the padded slab
    # directly should do so (columns 20..127 hold sigmoid(0)=0.5 and must be ignored).
    return out_pad[:, :OUT_FEATS]


def reference(x, conv_w, bn_gamma, bn_beta, fc_w):
    """Pure-JAX reference of the PyTorch forward."""
    y = jax.lax.conv_general_dilated(
        x, conv_w, window_strides=(1,), padding=((1, 1),),
        dimension_numbers=("NCH", "OIH", "NCH"))                 # (N, 1, L)
    mean = jnp.mean(y)
    var = jnp.mean((y - mean) ** 2)
    y = (y - mean) / jnp.sqrt(var + BN_EPS) * bn_gamma[0] + bn_beta[0]
    feats = jnp.transpose(y, (0, 2, 1)).reshape(-1, IN_FEATS)
    return jax.nn.sigmoid(feats @ fc_w.T)


if __name__ == "__main__":
    key = jax.random.PRNGKey(0)
    k_x, k_cw, k_fc = jax.random.split(key, 3)

    N, C_IN, L = 2, 15, 10                                       # (N*L) % 10 == 0

    x = jax.random.normal(k_x, (N, C_IN, L), dtype=jnp.float32)

    # Deterministic parameter init (shapes match the PyTorch module's __init__).
    conv_bound = 1.0 / (C_IN * KSIZE) ** 0.5
    conv_w = jax.random.uniform(k_cw, (1, C_IN, KSIZE), jnp.float32,
                                minval=-conv_bound, maxval=conv_bound)
    bn_gamma = jnp.ones((1,), jnp.float32)                       # PyTorch BN default
    bn_beta = jnp.zeros((1,), jnp.float32)
    fc_bound = 1.0 / (IN_FEATS ** 0.5)
    fc_w = jax.random.uniform(k_fc, (OUT_FEATS, IN_FEATS), jnp.float32,
                              minval=-fc_bound, maxval=fc_bound)

    # One-time parameter prep (hoisted out of the per-call forward).
    slab, bn = prepare_params(conv_w, bn_gamma, bn_beta, fc_w)
    slab, bn = jax.block_until_ready((slab, bn))

    out = model_forward(x, slab, bn)
    out = jax.block_until_ready(out)

    ref = reference(x, conv_w, bn_gamma, bn_beta, fc_w)
    assert out.shape == (N * L // IN_FEATS, OUT_FEATS), out.shape
    assert jnp.allclose(out, ref, rtol=1e-4, atol=1e-5), (
        f"max abs diff {jnp.max(jnp.abs(out - ref))}")

    print("KERNEL_OK")
</pallas_src>

<mosaic_0001>
module attributes {stable_mosaic.version = 11 : i64} {
  func.func @fused_kernel(%arg0: memref<17x20xf32, #tpu.memory_space<vmem>>, %arg1: memref<2xf32, #tpu.memory_space<smem>>, %arg2: memref<32x128xf32, #tpu.memory_space<vmem>>, %arg3: memref<2x128xf32, #tpu.memory_space<vmem>>, %arg4: memref<3x22xf32, #tpu.memory_space<vmem>>, %arg5: memref<2x10xf32, #tpu.memory_space<vmem>>) attributes {dimension_semantics = [], scalar_prefetch = 0 : i64, scratch_operands = 2 : i64, tpu.core_type = #tpu.core_type<tc>} {
    %c0 = arith.constant 0 : index
    %c0_0 = arith.constant 0 : index
    %0 = vector.load %arg0[%c0, %c0_0] : memref<17x20xf32, #tpu.memory_space<vmem>>, vector<15x20xf32>
    %c15 = arith.constant 15 : index
    %c0_1 = arith.constant 0 : index
    %1 = vector.load %arg0[%c15, %c0_1] : memref<17x20xf32, #tpu.memory_space<vmem>>, vector<1x20xf32>
    %c16 = arith.constant 16 : index
    %c0_2 = arith.constant 0 : index
    %2 = vector.load %arg0[%c16, %c0_2] : memref<17x20xf32, #tpu.memory_space<vmem>>, vector<1x20xf32>
    %c16_3 = arith.constant 16 : index
    %c0_4 = arith.constant 0 : index
    %3 = vector.load %arg2[%c16_3, %c0_4] : memref<32x128xf32, #tpu.memory_space<vmem>>, vector<15x1xf32>
    %c16_5 = arith.constant 16 : index
    %c1 = arith.constant 1 : index
    %4 = vector.load %arg2[%c16_5, %c1] : memref<32x128xf32, #tpu.memory_space<vmem>>, vector<15x1xf32>
    %c16_6 = arith.constant 16 : index
    %c2 = arith.constant 2 : index
    %5 = vector.load %arg2[%c16_6, %c2] : memref<32x128xf32, #tpu.memory_space<vmem>>, vector<15x1xf32>
    %6 = vector.broadcast %3 : vector<15x1xf32> to vector<15x20xf32>
    %7 = arith.mulf %0, %6 : vector<15x20xf32>
    %cst = arith.constant dense<0.000000e+00> : vector<20xf32>
    %8 = vector.multi_reduction <add>, %7, %cst [0] : vector<15x20xf32> to vector<20xf32>
    %9 = vector.shape_cast %8 : vector<20xf32> to vector<1x20xf32>
    %10 = arith.mulf %9, %1 : vector<1x20xf32>
    %11 = vector.broadcast %4 : vector<15x1xf32> to vector<15x20xf32>
    %12 = arith.mulf %0, %11 : vector<15x20xf32>
    %cst_7 = arith.constant dense<0.000000e+00> : vector<20xf32>
    %13 = vector.multi_reduction <add>, %12, %cst_7 [0] : vector<15x20xf32> to vector<20xf32>
    %14 = vector.shape_cast %13 : vector<20xf32> to vector<1x20xf32>
    %15 = vector.broadcast %5 : vector<15x1xf32> to vector<15x20xf32>
    %16 = arith.mulf %0, %15 : vector<15x20xf32>
    %cst_8 = arith.constant dense<0.000000e+00> : vector<20xf32>
    %17 = vector.multi_reduction <add>, %16, %cst_8 [0] : vector<15x20xf32> to vector<20xf32>
    %18 = vector.shape_cast %17 : vector<20xf32> to vector<1x20xf32>
    %19 = arith.mulf %18, %2 : vector<1x20xf32>
    %cst_9 = arith.constant 0.000000e+00 : f32
    %20 = vector.broadcast %cst_9 : f32 to vector<3x22xf32>
    %c0_10 = arith.constant 0 : index
    %c0_11 = arith.constant 0 : index
    %21 = vector.load %arg4[%c0_10, %c0_11] : memref<3x22xf32, #tpu.memory_space<vmem>>, vector<3x22xf32>
    tpu.vector_store %arg4[%c0_10, %c0_11], %20 {strides = array<i32>} : memref<3x22xf32, #tpu.memory_space<vmem>>, vector<3x22xf32>,
    %c0_12 = arith.constant 0 : index
    %c0_13 = arith.constant 0 : index
    %22 = vector.load %arg4[%c0_12, %c0_13] : memref<3x22xf32, #tpu.memory_space<vmem>>, vector<1x20xf32>
    tpu.vector_store %arg4[%c0_12, %c0_13], %19 {strides = array<i32>} : memref<3x22xf32, #tpu.memory_space<vmem>>, vector<1x20xf32>,
    %c1_14 = arith.constant 1 : index
    %c1_15 = arith.constant 1 : index
    %23 = vector.load %arg4[%c1_14, %c1_15] : memref<3x22xf32, #tpu.memory_space<vmem>>, vector<1x20xf32>
    tpu.vector_store %arg4[%c1_14, %c1_15], %14 {strides = array<i32>} : memref<3x22xf32, #tpu.memory_space<vmem>>, vector<1x20xf32>,
    %c2_16 = arith.constant 2 : index
    %c2_17 = arith.constant 2 : index
    %24 = vector.load %arg4[%c2_16, %c2_17] : memref<3x22xf32, #tpu.memory_space<vmem>>, vector<1x20xf32>
    tpu.vector_store %arg4[%c2_16, %c2_17], %10 {strides = array<i32>} : memref<3x22xf32, #tpu.memory_space<vmem>>, vector<1x20xf32>,
    %c0_18 = arith.constant 0 : index
    %c1_19 = arith.constant 1 : index
    %25 = vector.load %arg4[%c0_18, %c1_19] : memref<3x22xf32, #tpu.memory_space<vmem>>, vector<3x10xf32>
    %cst_20 = arith.constant dense<0.000000e+00> : vector<10xf32>
    %26 = vector.multi_reduction <add>, %25, %cst_20 [0] : vector<3x10xf32> to vector<10xf32>
    %27 = vector.shape_cast %26 : vector<10xf32> to vector<1x10xf32>
    %c0_21 = arith.constant 0 : index
    %c0_22 = arith.constant 0 : index
    %28 = vector.load %arg5[%c0_21, %c0_22] : memref<2x10xf32, #tpu.memory_space<vmem>>, vector<1x10xf32>
    tpu.vector_store %arg5[%c0_21, %c0_22], %27 {strides = array<i32>} : memref<2x10xf32, #tpu.memory_space<vmem>>, vector<1x10xf32>,
    %c0_23 = arith.constant 0 : index
    %c11 = arith.constant 11 : index
    %29 = vector.load %arg4[%c0_23, %c11] : memref<3x22xf32, #tpu.memory_space<vmem>>, vector<3x10xf32>
    %cst_24 = arith.constant dense<0.000000e+00> : vector<10xf32>
    %30 = vector.multi_reduction <add>, %29, %cst_24 [0] : vector<3x10xf32> to vector<10xf32>
    %31 = vector.shape_cast %30 : vector<10xf32> to vector<1x10xf32>
    %c1_25 = arith.constant 1 : index
    %c0_26 = arith.constant 0 : index
    %32 = vector.load %arg5[%c1_25, %c0_26] : memref<2x10xf32, #tpu.memory_space<vmem>>, vector<1x10xf32>
    tpu.vector_store %arg5[%c1_25, %c0_26], %31 {strides = array<i32>} : memref<2x10xf32, #tpu.memory_space<vmem>>, vector<1x10xf32>,
    %c0_27 = arith.constant 0 : index
    %c0_28 = arith.constant 0 : index
    %33 = vector.load %arg5[%c0_27, %c0_28] : memref<2x10xf32, #tpu.memory_space<vmem>>, vector<2x10xf32>
    %34 = vector.shape_cast %33 : vector<2x10xf32> to vector<1x2x10xf32>
    %cst_29 = arith.constant dense<0.000000e+00> : vector<1xf32>
    %35 = vector.multi_reduction <add>, %34, %cst_29 [1, 2] : vector<1x2x10xf32> to vector<1xf32>
    %36 = vector.shape_cast %35 : vector<1xf32> to vector<1x1x1xf32>
    %37 = vector.extract %36[0, 0, 0] : f32 from vector<1x1x1xf32>
    %38 = vector.broadcast %37 : f32 to vector<1x1xf32>
    %cst_30 = arith.constant 2.000000e+01 : f32
    %39 = vector.broadcast %cst_30 : f32 to vector<1x1xf32>
    %40 = arith.divf %38, %39 : vector<1x1xf32>
    %41 = vector.broadcast %40 : vector<1x1xf32> to vector<2x10xf32>
    %42 = arith.subf %33, %41 : vector<2x10xf32>
    %43 = arith.mulf %42, %42 : vector<2x10xf32>
    %44 = vector.shape_cast %43 : vector<2x10xf32> to vector<1x2x10xf32>
    %cst_31 = arith.constant dense<0.000000e+00> : vector<1xf32>
    %45 = vector.multi_reduction <add>, %44, %cst_31 [1, 2] : vector<1x2x10xf32> to vector<1xf32>
    %46 = vector.shape_cast %45 : vector<1xf32> to vector<1x1x1xf32>
    %47 = vector.extract %46[0, 0, 0] : f32 from vector<1x1x1xf32>
    %48 = vector.broadcast %47 : f32 to vector<1x1xf32>
    %cst_32 = arith.constant 2.000000e+01 : f32
    %49 = vector.broadcast %cst_32 : f32 to vector<1x1xf32>
    %50 = arith.divf %48, %49 : vector<1x1xf32>
    %c0_33 = arith.constant 0 : index
    %51 = memref.load %arg1[%c0_33] : memref<2xf32, #tpu.memory_space<smem>>
    %c1_34 = arith.constant 1 : index
    %52 = memref.load %arg1[%c1_34] : memref<2xf32, #tpu.memory_space<smem>>
    %cst_35 = arith.constant 9.99999974E-6 : f32
    %53 = vector.broadcast %cst_35 : f32 to vector<1x1xf32>
    %54 = arith.addf %50, %53 : vector<1x1xf32>
    %55 = math.rsqrt %54 : vector<1x1xf32>
    %56 = vector.broadcast %51 : f32 to vector<1x1xf32>
    %57 = arith.mulf %56, %55 : vector<1x1xf32>
    %58 = arith.mulf %40, %57 : vector<1x1xf32>
    %59 = vector.broadcast %52 : f32 to vector<1x1xf32>
    %60 = arith.subf %59, %58 : vector<1x1xf32>
    %c0_36 = arith.constant 0 : index
    %c0_37 = arith.constant 0 : index
    %61 = vector.load %arg2[%c0_36, %c0_37] : memref<32x128xf32, #tpu.memory_space<vmem>>, vector<10x128xf32>
    %c10 = arith.constant 10 : index
    %c0_38 = arith.constant 0 : index
    %62 = vector.load %arg2[%c10, %c0_38] : memref<32x128xf32, #tpu.memory_space<vmem>>, vector<1x128xf32>
    %cst_39 = arith.constant dense<0.000000e+00> : vector<2x128xf32>
    %63 = tpu.matmul %33, %61, %cst_39 {dimension_numbers = #tpu.dot_dimension_numbers<[1], [0], [0], [1], [0, 0, 1, 1], [], []>} : vector<2x10xf32>, vector<10x128xf32>, vector<2x128xf32> -> vector<2x128xf32>
    %64 = vector.broadcast %57 : vector<1x1xf32> to vector<2x128xf32>
    %65 = arith.mulf %64, %63 : vector<2x128xf32>
    %66 = vector.broadcast %60 : vector<1x1xf32> to vector<1x128xf32>
    %67 = arith.mulf %66, %62 : vector<1x128xf32>
    %68 = vector.broadcast %67 : vector<1x128xf32> to vector<2x128xf32>
    %69 = arith.addf %65, %68 : vector<2x128xf32>
    %70 = arith.negf %69 : vector<2x128xf32>
    %71 = math.exp %70 : vector<2x128xf32>
    %cst_40 = arith.constant 1.000000e+00 : f32
    %72 = vector.broadcast %cst_40 : f32 to vector<2x128xf32>
    %73 = arith.addf %72, %71 : vector<2x128xf32>
    %74 = arith.divf %72, %73 : vector<2x128xf32>
    %c0_41 = arith.constant 0 : index
    %c0_42 = arith.constant 0 : index
    %75 = vector.load %arg3[%c0_41, %c0_42] : memref<2x128xf32, #tpu.memory_space<vmem>>, vector<2x128xf32>
    tpu.vector_store %arg3[%c0_41, %c0_42], %74 {strides = array<i32>} : memref<2x128xf32, #tpu.memory_space<vmem>>, vector<2x128xf32>,
    return
  }
}

</mosaic_0001>

<bundles_post_ra>
// kernel: model_forward.1
= control target key start
LH: loop header
LB: loop body
LE: loop exit
PB: predicated region body
PF: predicated region fallthrough
CT: control target
= control target key end

     0   :  { %8 = vsyncpa [#allocation6], 0  ;;  %s410_s0 = inlined_call_operand.vmem [shape: f32[17,20], index: 0, kind: input, shape index: {}]   ;;  %s411_s1 = inlined_call_operand.vmem [shape: f32[2], index: 1, kind: input, shape index: {}]   ;;  %s412_s2 = inlined_call_operand.vmem [shape: f32[32,128], index: 2, kind: input, shape index: {}]   ;;  %s413_s3 = inlined_call_operand.hbm [shape: f32[2,128], index: 3, kind: output, shape index: {}]  }
   0x1   :  { %9 = vsyncpa [#allocation5], 0  ;;  %s17_s14 = sshll.u32 %s411_s1, 4  ;;  %s338_s15 = smov [#allocation4]   ;;  %s18_s14 = int_to_ptr.vmem [resolvable:$true] %s17_s14 }
   0x2   :  { %20 = dma.vmem_to_smem %s18_s14, 16, %s338_s15, [#allocation6]  }
   0x3   :  { %334 = dma.done.wait [#allocation6], 16  }
   0x4   :  { %335 = vsyncadd [#allocation6], 4294967280 }
   0x5   :  { %27 = sfence }
   0x6   :  { %v32_v0 = vld [vmem:[%s412_s2 + $0x10] sm:$0xff]  ;;  %v339_v1 = vmov 1   ;;  %v340_v2 = vmov 0   ;;  %v33_v3 = vld [vmem:[%s412_s2 + $0x18] sm:$0x7f]  ;;  %v341_v4 = vmov 2  }
   0x7   :  { %287 = vset.pattern.permute.xlu1 %v339_v1  ;;  %286 = vset.pattern.permute.xlu0 %v340_v2  ;;  %v28_v7 = vld [vmem:[%s410_s0] sm:$0xff]  ;;  %v29_v8 = vld [vmem:[%s410_s0 + $0x8] sm:$0x7f]  ;;  %vm46_vm0 = vcmask 162816   ;;  %vm48_vm1 = vcmask 161792   ;;  %s342_s25 = smov 1  }
   0x8   :  { %59 = vperm.xlu1 %287, %v32_v0   ;;  %36 = vperm.xlu0 %286, %v32_v0   ;;  %v30_v31 = vld [vmem:[%s410_s0 + $0xf] sm:$0x1]  ;;  %s343_s26 = smov 2   ;;  %vm97_vm2 = vcmask 174080   ;;  %v344_v35 = vmov 0.0   ;;  %vm99_vm3 = vcmask 155648  }
   0x9   :  { %288 = vset.pattern.permute.xlu2 %v341_v4  ;;  %98 = vst.msk [vmem:[#allocation2] sm:$0x7] %vm97_vm2, %v344_v35  ;;  %v31_v48 = vld [vmem:[%s410_s0 + $0x10] sm:$0x1]  ;;  %vm105_vm4 = vcmask 163848   ;;  %vm111_vm5 = vcmask 172048  }
   0xa   :  { %78 = vperm.xlu2 %288, %v32_v0   ;;  %vm129_vm6 = vcmask 165976   ;;  %vm114_vm7 = vcmask 83976   ;;  %s345_s0 = smov 117   ;;  %s346_s29 = smov 127   ;;  %vm202_vm8 = vcmask 1041408   ;;  %vm126_vm9 = vcmask 73728  }
   0xb   :  { %vm198_vm10 = vcmask 80896   ;;  %vm143_vm11 = vcmask 74752   ;;  %s177_s9 = sld [smem:[#allocation4]]  ;;  %s348_s13 = smov [#allocation7]  }
   0xc   :  { %s267_s10 = sld [smem:[#allocation4 + $0x1]]  ;;  %s257_s16 = sshll.u32 %s413_s3, 4  ;;  %s258_s16 = int_to_ptr.hbm [resolvable:$true] %s257_s16 }
  0x10   :  { %63 = vperm.xlu1 %287, %v33_v3   ;;  %41 = vperm.xlu0 %286, %v33_v3  }
  0x12   :  { %82 = vperm.xlu2 %288, %v33_v3  }
  0x18   :  { %289 = vset.pattern.permute.xlu0 %v341_v4 }
  0x64   :  { %v79_v36 = vpop.permute.xlu2 %78 }
  0x65   :  { %v85_v37 = vmul.f32 %v79_v36, %v28_v7 }
  0x67   :  { %v87_v39 = vsel %vm46_vm0, %v85_v37, 0.0 }
  0x6c   :  { %v83_v38 = vpop.permute.xlu2 %82 }
  0x6d   :  { %v86_v40 = vmul.f32 %v83_v38, %v29_v8 }
  0x6f   :  { %v88_v41 = vsel %vm48_vm1, %v86_v40, 0.0 }
  0x70   :  { %v89_v42 = vadd.f32 %v88_v41, %v87_v39 }
  0x72   :  { %v90_v43 = vrot.slane %v89_v42, 4 }
  0x74   :  { %v91_v44 = vadd.f32 %v90_v43, %v89_v42 }
  0x76   :  { %v92_v45 = vrot.slane %v91_v44, 2 }
  0x78   :  { %v93_v46 = vadd.f32 %v92_v45, %v91_v44 }
  0x7a   :  { %v60_v5 = vpop.permute.xlu1 %59  ;;  %v37_v6 = vpop.permute.xlu0 %36  ;;  %v94_v47 = vrot.slane %v93_v46, 1 }
  0x7b   :  { %v66_v9 = vmul.f32 %v60_v5, %v28_v7  ;;  %v44_v10 = vmul.f32 %v37_v6, %v28_v7  ;;  %v196_v5 = vld [vmem:[%s412_s2 + $0x8] sm:$0x3]  ;;  %v195_v6 = vld [vmem:[%s412_s2] sm:$0xff] }
  0x7c   :  { %v95_v49 = vadd.f32 %v94_v47, %v93_v46  ;;  %268 = vmatpush.msk.msra.mxu0 %vm202_vm8, %v196_v5  ;;  %v190_v46 = vstv %s177_s9 }
  0x7d   :  { %v68_v15 = vsel %vm46_vm0, %v66_v9, 0.0  ;;  %v47_v16 = vsel %vm46_vm0, %v44_v10, 0.0 }
  0x7e   :  { %v96_v50 = vmul.f32 %v95_v49, %v31_v48  ;;  %221 = vmatpush.msra.mxu0 %v195_v6  ;;  %v193_v49 = vstv %s267_s10 }
  0x80   :  { %100 = vst.msk [vmem:[#allocation2] sm:$0x1] %vm99_vm3, %v96_v50 }
  0x82   :  { %v64_v11 = vpop.permute.xlu1 %63  ;;  %v42_v12 = vpop.permute.xlu0 %41 }
  0x83   :  { %v67_v13 = vmul.f32 %v64_v11, %v29_v8  ;;  %v45_v14 = vmul.f32 %v42_v12, %v29_v8 }
  0x85   :  { %v69_v17 = vsel %vm48_vm1, %v67_v13, 0.0  ;;  %v49_v18 = vsel %vm48_vm1, %v45_v14, 0.0 }
  0x86   :  { %v70_v19 = vadd.f32 %v69_v17, %v68_v15  ;;  %v50_v20 = vadd.f32 %v49_v18, %v47_v16  ;;  %v347_v18 = vmov 20.0  }
  0x87   :  { %290 = vrcp.f32 %v347_v18 }
  0x88   :  { %v71_v21 = vrot.slane %v70_v19, 4  ;;  %v51_v22 = vrot.slane %v50_v20, 4 }
  0x8a   :  { %v72_v23 = vadd.f32 %v71_v21, %v70_v19  ;;  %v52_v24 = vadd.f32 %v51_v22, %v50_v20 }
  0x8c   :  { %v73_v25 = vrot.slane %v72_v23, 2  ;;  %v53_v26 = vrot.slane %v52_v24, 2 }
  0x8d   :  { %v291_v19 = vpop.eup %290 }
  0x8e   :  { %v54_v27 = vadd.f32 %v53_v26, %v52_v24  ;;  %v74_v28 = vadd.f32 %v73_v25, %v72_v23  ;;  %v156_v20 = vmul.f32 20.0, %v291_v19  ;;  %vm160_vm12 = vweird.f32 %v291_v19 }
  0x90   :  { %v75_v29 = vrot.slane %v74_v28, 1  ;;  %v55_v30 = vrot.slane %v54_v27, 1  ;;  %v157_v21 = vsub.f32 1.0, %v156_v20 }
  0x92   :  { %v76_v32 = vadd.f32 %v75_v29, %v74_v28  ;;  %v56_v33 = vadd.f32 %v55_v30, %v54_v27  ;;  %v158_v22 = vmul.f32 %v291_v19, %v157_v21 }
  0x94   :  { %102 = vrot.lane.b32.xlu0 %v76_v32, %s342_s25  ;;  %v57_v34 = vmul.f32 %v56_v33, %v30_v31  ;;  %v159_v23 = vadd.f32 %v291_v19, %v158_v22 }
  0x96   :  { %108 = vrot.lane.b32.xlu1 %v57_v34, %s343_s26  ;;  %v161_v24 = vsel %vm160_vm12, %v291_v19, %v159_v23 }
 0x106   :  { %v103_v51 = vpop.permute.xlu0 %102 }
 0x107   :  { %106 = vst.msk [vmem:[#allocation2 + $0x1] sm:$0x1] %vm105_vm4, %v103_v51  ;;  %v197_v51 = vld [vmem:[%s412_s2 + $0xa] sm:$0x1]  ;;  %s255_s2 = sshll.u32 %s348_s13, 4  ;;  %s256_s2 = int_to_ptr.vmem [resolvable:$true] %s255_s2 }
 0x108   :  { %v109_v52 = vpop.permute.xlu1 %108 }
 0x109   :  { %112 = vst.msk [vmem:[#allocation2 + $0x2] sm:$0x1] %vm111_vm5, %v109_v52 }
 0x110   :  { %v128_v53 = vld [vmem:[#allocation2] sm:$0x7] }
 0x111   :  { %v113_v54 = vld [vmem:[#allocation2] sm:$0x7]  ;;  %v130_v55 = vsel %vm129_vm6, %v128_v53, 0.0 }
 0x112   :  { %v115_v56 = vsel %vm114_vm7, %v113_v54, 0.0  ;;  %v131_v57 = vrot.slane %v130_v55, 4 }
 0x113   :  { %v116_v58 = vrot.slane %v115_v56, 4 }
 0x114   :  { %v132_v59 = vadd.f32 %v131_v57, %v130_v55 }
 0x115   :  { %v117_v60 = vadd.f32 %v116_v58, %v115_v56 }
 0x116   :  { %v133_v61 = vrot.slane %v132_v59, 2 }
 0x117   :  { %v118_v62 = vrot.slane %v117_v60, 2 }
 0x118   :  { %v134_v63 = vadd.f32 %v133_v61, %v132_v59 }
 0x119   :  { %v119_v0 = vadd.f32 %v118_v62, %v117_v60 }
 0x11a   :  { %v135_v1 = vrot.slane %v134_v63, 1 }
 0x11b   :  { %v120_v2 = vrot.slane %v119_v0, 1 }
 0x11c   :  { %v136_v3 = vadd.f32 %v135_v1, %v134_v63 }
 0x11d   :  { %v121_v4 = vadd.f32 %v120_v2, %v119_v0 }
 0x11e   :  { %138 = vrot.lane.b32.xlu0 %v136_v3, %s345_s0 }
 0x11f   :  { %123 = vrot.lane.b32.xlu2 %v121_v4, %s346_s29 }
 0x179   :  { %v124_v7 = vpop.permute.xlu2 %123 }
 0x17a   :  { %127 = vst.msk [vmem:[#allocation3] sm:$0x1] %vm126_vm9, %v124_v7 }
 0x190   :  { %v139_v8 = vpop.permute.xlu0 %138 }
 0x191   :  { %141 = vst.msk [vmem:[#allocation3 + $0x1] sm:$0x1] %vm126_vm9, %v139_v8 }
 0x198   :  { %v142_v9 = vld [vmem:[#allocation3] sm:$0x3] }
 0x199   :  { %269 = vmatmul.msk.f32.vlgmr.msra.gmra.mxu0 %vm198_vm10, %v142_v9  ;;  %v144_v10 = vsel %vm143_vm11, %v142_v9, 0.0 }
 0x19a   :  { %145 = vadd.xlane.f32.xlu1 %v144_v10 }
 0x20d   :  { %v146_v11 = vpop.xlane.xlu1 %145 }
 0x20e   :  { %v147_v12 = vrot.slane %v146_v11, 4 }
 0x210   :  { %v148_v13 = vadd.f32 %v147_v12, %v146_v11 }
 0x212   :  { %v149_v14 = vrot.slane %v148_v13, 2 }
 0x214   :  { %v150_v15 = vadd.f32 %v149_v14, %v148_v13 }
 0x216   :  { %v151_v16 = vrot.slane %v150_v15, 1  ;;  %v223_v54 = vpop.f32.mrf.mxu0 }
 0x218   :  { %v152_v17 = vadd.f32 %v151_v16, %v150_v15 }
 0x21a   :  { %271 = vpush %v152_v17 }
 0x24b   :  { %s272_s7 = spop %271 }
 0x24c   :  { %v154_v25 = vstv %s272_s7 }
 0x24d   :  { %v162_v26 = vmul.f32 %v161_v24, %v154_v25 }
 0x24f   :  { %v163_v27 = vsub.f32 %v142_v9, %v162_v26 }
 0x251   :  { %v164_v28 = vmul.f32 %v163_v27, %v163_v27 }
 0x253   :  { %v165_v29 = vsel %vm143_vm11, %v164_v28, 0.0 }
 0x254   :  { %166 = vadd.xlane.f32.xlu2 %v165_v29 }
 0x2c7   :  { %v167_v30 = vpop.xlane.xlu2 %166 }
 0x2c8   :  { %v168_v31 = vrot.slane %v167_v30, 4 }
 0x2ca   :  { %v169_v32 = vadd.f32 %v168_v31, %v167_v30 }
 0x2cc   :  { %v170_v33 = vrot.slane %v169_v32, 2 }
 0x2ce   :  { %v171_v34 = vadd.f32 %v170_v33, %v169_v32 }
 0x2d0   :  { %v172_v35 = vrot.slane %v171_v34, 1 }
 0x2d2   :  { %v173_v36 = vadd.f32 %v172_v35, %v171_v34 }
 0x2d4   :  { %273 = vpush %v173_v36 }
 0x305   :  { %s274_s8 = spop %273 }
 0x306   :  { %v175_v37 = vstv %s274_s8 }
 0x307   :  { %v176_v38 = vmul.f32 %v175_v37, %v161_v24 }
 0x309   :  { %v179_v39 = vadd.f32 1e-05, %v176_v38 }
 0x30b   :  { %292 = vrsqrt.f32 %v179_v39  ;;  %vm186_vm14 = vweird.f32 %v179_v39 }
 0x311   :  { %v293_v40 = vpop.eup %292 }
 0x312   :  { %v181_v41 = vmul.f32 %v293_v40, %v179_v39  ;;  %vm187_vm13 = vweird.f32 %v293_v40 }
 0x313   :  { %vm188_vm15 = vmor %vm186_vm14, %vm187_vm13 }
 0x314   :  { %v182_v42 = vmul.f32 %v293_v40, %v181_v41 }
 0x316   :  { %v183_v43 = vmul.f32 0.5, %v182_v42 }
 0x318   :  { %v184_v44 = vsub.f32 1.5, %v183_v43 }
 0x31a   :  { %v185_v45 = vmul.f32 %v293_v40, %v184_v44 }
 0x31c   :  { %v189_v47 = vsel %vm188_vm15, %v293_v40, %v185_v45 }
 0x31d   :  { %v191_v48 = vmul.f32 %v190_v46, %v189_v47 }
 0x31f   :  { %v192_v50 = vmul.f32 %v191_v48, %v162_v26  ;;  %v226_v55 = vmul.f32 %v223_v54, %v191_v48 }
 0x321   :  { %v194_v52 = vsub.f32 %v193_v49, %v192_v50 }
 0x323   :  { %v227_v53 = vmul.f32 %v197_v51, %v194_v52 }
 0x325   :  { %v228_v56 = vperm.slane %v227_v53, 0 }
 0x327   :  { %v229_v57 = vadd.f32 %v228_v56, %v226_v55 }
 0x329   :  { %v270_v58 = vmul.f32 -1.442695, %v229_v57 }
 0x32b   :  { %294 = vpow2.f32 %v270_v58 }
 0x331   :  { %v295_v59 = vpop.eup %294 }
 0x332   :  { %v233_v60 = vadd.f32 1.0, %v295_v59 }
 0x334   :  { %296 = vrcp.f32 %v233_v60  ;;  %v245_v0 = vand.u32 2147483648, %v233_v60  ;;  %v243_v2 = vand.u32 2147483647, %v233_v60  ;;  %vm239_vm1 = vweird.f32 %v233_v60 }
 0x336   :  { %v246_v4 = vor.u32 1.1754944e-38, %v245_v0  ;;  %vm244_vm3 = vcmp.eq.f32.partialorder %v243_v2, 8.507059e+37 }
 0x33a   :  { %v297_v61 = vpop.eup %296 }
 0x33b   :  { %v235_v62 = vmul.f32 %v297_v61, %v233_v60  ;;  %vm240_vm0 = vweird.f32 %v297_v61 }
 0x33c   :  { %vm241_vm2 = vmor %vm239_vm1, %vm240_vm0 }
 0x33d   :  { %v236_v63 = vsub.f32 1.0, %v235_v62 }
 0x33f   :  { %v237_v1 = vmul.f32 %v297_v61, %v236_v63 }
 0x341   :  { %v238_v3 = vadd.f32 %v297_v61, %v237_v1 }
 0x343   :  { %v242_v5 = vsel %vm241_vm2, %v297_v61, %v238_v3 }
 0x344   :  { %v247_v6 = vsel %vm244_vm3, %v246_v4, %v242_v5 }
 0x345   :  { %249 = vst [vmem:[#allocation7] sm:$0x3] %v247_v6 }
 0x346   :  { %260 = dma.vmem_to_hbm [thread:$0]  %s256_s2, 32, %s258_s16, [#allocation5]  }
 0x347   :  { %336 = dma.done.wait [#allocation5], 32  }
 0x348   :  { %337 = vsyncadd [#allocation5], 4294967264 }
 0x349   :  { %265 = vsyncpa [#allocation5], 1 }
 0x34a   :  { %266 = vsyncpa [#allocation6], 1 }

</bundles_post_ra>
